<compile_context>
chip_gen: v7x
topology: tpu7x:2x2x1
jax: 0.10.0
libtpu: 0.0.40
codegen_flags: <defaults>
</compile_context>

<pallas_src>
import functools

import jax
import jax.numpy as jnp
from jax.experimental import pallas as pl
from jax.experimental.pallas import tpu as pltpu


def _dice_partials_dense_kernel(pred_ref, target_ref, out_ref, *,
                                label_smoothing, inv_outchannels):
    # pred_ref/target_ref: (1, C, THW) native dtype; out_ref: (1, 1, 3, C) f32
    p = jax.nn.sigmoid(pred_ref[...].astype(jnp.float32))
    t = target_ref[...].astype(jnp.float32)
    t = t * (1.0 - label_smoothing) + label_smoothing * inv_outchannels

    inter = jnp.sum(p * t, axis=2)   # (1, C)
    a_sum = jnp.sum(p * p, axis=2)   # (1, C)
    b_sum = jnp.sum(t * t, axis=2)   # (1, C)

    # Separate row writes (no cross-sublane stack/relayout).
    out_ref[0, 0, 0:1, :] = inter
    out_ref[0, 0, 1:2, :] = a_sum
    out_ref[0, 0, 2:3, :] = b_sum


def _dice_partials_label_kernel(pred_ref, label_ref, out_ref, *,
                                label_smoothing, inv_outchannels):
    # pred_ref: (1, C, THW); label_ref: (1, 1, THW) int32; out_ref: (1,1,3,C)
    p = jax.nn.sigmoid(pred_ref[...].astype(jnp.float32))
    labels = label_ref[...]                                   # (1, 1, THW)

    hi = jnp.float32((1.0 - label_smoothing) + label_smoothing * inv_outchannels)
    lo = jnp.float32(label_smoothing * inv_outchannels)
    ch = jax.lax.broadcasted_iota(jnp.int32, p.shape, dimension=1)  # (1,C,THW)
    t = jnp.where(labels == ch, hi, lo)                       # smoothed one-hot

    inter = jnp.sum(p * t, axis=2)   # (1, C)
    a_sum = jnp.sum(p * p, axis=2)   # (1, C)
    b_sum = jnp.sum(t * t, axis=2)   # (1, C)

    out_ref[0, 0, 0:1, :] = inter
    out_ref[0, 0, 1:2, :] = a_sum
    out_ref[0, 0, 2:3, :] = b_sum


def _choose_hw_tile(hw, c, itemsize, budget_bytes=1 << 20):
    """Largest multiple-of-128 divisor of hw with a (c, tile) block <= budget."""
    if hw % 128 != 0:
        return hw                     # fall back to the full (untiled) extent
    best = None
    tile = 128
    while tile <= hw:
        if hw % tile == 0 and c * tile * itemsize <= budget_bytes:
            best = tile
        tile += 128
    return best if best is not None else 128


def dice_loss(pred, target, *, w, smooth=1.0, label_smoothing=0.0,
              outchannels=1):
    """JAX/Pallas equivalent of diceloss.forward (act=sigmoid, masked=False)."""
    if len(w) != outchannels:
        raise ValueError('Loss weights should be equal to the output channels.')

    N, C, H, W = pred.shape
    HW = H * W
    pred2 = pred.reshape(N, C, HW)                    # native dtype, no upcast

    use_labels = pred.ndim > target.ndim              # integer label-map path
    if use_labels:
        other = target.reshape(N, 1, HW).astype(jnp.int32)
        in_itemsize = max(jnp.dtype(pred2.dtype).itemsize, 4)
    else:
        other = target.reshape(N, C, HW)              # native dtype, no upcast
        in_itemsize = max(jnp.dtype(pred2.dtype).itemsize,
                          jnp.dtype(other.dtype).itemsize)

    thw = _choose_hw_tile(HW, C, in_itemsize)
    g_hw = HW // thw
    grid = (N, g_hw)

    pred_spec = pl.BlockSpec((1, C, thw), lambda i, j: (i, 0, j))
    if use_labels:
        kernel = functools.partial(
            _dice_partials_label_kernel,
            label_smoothing=float(label_smoothing),
            inv_outchannels=1.0 / float(outchannels))
        other_spec = pl.BlockSpec((1, 1, thw), lambda i, j: (i, 0, j))
    else:
        kernel = functools.partial(
            _dice_partials_dense_kernel,
            label_smoothing=float(label_smoothing),
            inv_outchannels=1.0 / float(outchannels))
        other_spec = pl.BlockSpec((1, C, thw), lambda i, j: (i, 0, j))

    partials = pl.pallas_call(
        kernel,
        out_shape=jax.ShapeDtypeStruct((N, g_hw, 3, C), jnp.float32),
        grid=grid,
        in_specs=[pred_spec, other_spec],
        out_specs=pl.BlockSpec((1, 1, 3, C), lambda i, j: (i, j, 0, 0)),
        compiler_params=pltpu.CompilerParams(
            dimension_semantics=("parallel", "parallel")),
    )(pred2, other)

    # Tiny epilogue in plain JAX: reduce partials, apply smooth + weights.
    sums = jnp.sum(partials, axis=(0, 1))             # (3, C)
    inter, a_sum, b_sum = sums[0], sums[1], sums[2]
    w_arr = jnp.asarray(w, dtype=jnp.float32)
    dice = 1.0 - (2.0 * inter + smooth) / (a_sum + b_sum + smooth)
    return jnp.sum(dice * w_arr)


def dice_loss_ref(pred, target, *, w, smooth, label_smoothing, outchannels):
    p = jax.nn.sigmoid(pred.astype(jnp.float32))
    t = target.astype(jnp.float32)
    t = t * (1.0 - label_smoothing) + label_smoothing / outchannels
    inter = jnp.sum(p * t, axis=(0, 2, 3))
    a_sum = jnp.sum(p * p, axis=(0, 2, 3))
    b_sum = jnp.sum(t * t, axis=(0, 2, 3))
    dice = 1.0 - (2.0 * inter + smooth) / (a_sum + b_sum + smooth)
    return jnp.sum(dice * jnp.asarray(w, dtype=jnp.float32))


if __name__ == "__main__":
    key = jax.random.PRNGKey(0)
    k1, k2, k3 = jax.random.split(key, 3)

    N, C, H, W = 2, 4, 16, 16
    smooth = 1.0
    label_smoothing = 0.1
    w = [0.5, 1.0, 1.5, 2.0]

    pred = jax.random.normal(k1, (N, C, H, W), dtype=jnp.float32)
    target = jax.random.bernoulli(k2, 0.4, (N, C, H, W)).astype(jnp.float32)

    # Dense-target path (target already has channel axis).
    out = dice_loss(pred, target, w=w, smooth=smooth,
                    label_smoothing=label_smoothing, outchannels=C)
    out = jax.block_until_ready(out)
    ref = dice_loss_ref(pred, target, w=w, smooth=smooth,
                        label_smoothing=label_smoothing, outchannels=C)
    assert jnp.allclose(out, ref, rtol=1e-5, atol=1e-5), (out, ref)

    # Integer label-map path (one-hot built in-kernel, never stored in HBM).
    labels = jax.random.randint(k3, (N, H, W), 0, C, dtype=jnp.int32)
    out2 = dice_loss(pred, labels, w=w, smooth=smooth,
                     label_smoothing=label_smoothing, outchannels=C)
    out2 = jax.block_until_ready(out2)
    ref2 = dice_loss_ref(pred, jax.nn.one_hot(labels, C, axis=1,
                                              dtype=jnp.float32),
                         w=w, smooth=smooth,
                         label_smoothing=label_smoothing, outchannels=C)
    assert jnp.allclose(out2, ref2, rtol=1e-5, atol=1e-5), (out2, ref2)

    print("KERNEL_OK")
</pallas_src>

<mosaic_0001>
module attributes {stable_mosaic.version = 11 : i64} {
  func.func @_dice_partials_dense_kernel(%arg0: i32, %arg1: i32, %arg2: memref<1x4x256xf32, #tpu.memory_space<vmem>>, %arg3: memref<1x4x256xf32, #tpu.memory_space<vmem>>, %arg4: memref<1x1x3x4xf32, #tpu.memory_space<vmem>>) attributes {dimension_semantics = [#tpu.dimension_semantics<parallel>, #tpu.dimension_semantics<parallel>], iteration_bounds = array<i64: 2, 1>, scalar_prefetch = 0 : i64, scratch_operands = 0 : i64, tpu.core_type = #tpu.core_type<tc>, window_params = [{transform_indices = @transform_0, window_bounds = array<i64: 1, 4, 256>}, {transform_indices = @transform_1, window_bounds = array<i64: 1, 4, 256>}, {transform_indices = @transform_2, window_bounds = array<i64: 1, 1, 3, 4>}]} {
    %c0 = arith.constant 0 : index
    %c0_0 = arith.constant 0 : index
    %c0_1 = arith.constant 0 : index
    %0 = vector.load %arg2[%c0, %c0_0, %c0_1] : memref<1x4x256xf32, #tpu.memory_space<vmem>>, vector<1x4x256xf32>
    %1 = arith.negf %0 : vector<1x4x256xf32>
    %2 = math.exp %1 : vector<1x4x256xf32>
    %cst = arith.constant 1.000000e+00 : f32
    %3 = vector.broadcast %cst : f32 to vector<1x4x256xf32>
    %4 = arith.addf %3, %2 : vector<1x4x256xf32>
    %5 = arith.divf %3, %4 : vector<1x4x256xf32>
    %c0_2 = arith.constant 0 : index
    %c0_3 = arith.constant 0 : index
    %c0_4 = arith.constant 0 : index
    %6 = vector.load %arg3[%c0_2, %c0_3, %c0_4] : memref<1x4x256xf32, #tpu.memory_space<vmem>>, vector<1x4x256xf32>
    %cst_5 = arith.constant 0.899999976 : f32
    %7 = vector.broadcast %cst_5 : f32 to vector<1x4x256xf32>
    %8 = arith.mulf %6, %7 : vector<1x4x256xf32>
    %cst_6 = arith.constant 2.500000e-02 : f32
    %9 = vector.broadcast %cst_6 : f32 to vector<1x4x256xf32>
    %10 = arith.addf %8, %9 : vector<1x4x256xf32>
    %11 = arith.mulf %5, %10 : vector<1x4x256xf32>
    %cst_7 = arith.constant dense<0.000000e+00> : vector<1x4xf32>
    %12 = vector.multi_reduction <add>, %11, %cst_7 [2] : vector<1x4x256xf32> to vector<1x4xf32>
    %13 = arith.mulf %5, %5 : vector<1x4x256xf32>
    %cst_8 = arith.constant dense<0.000000e+00> : vector<1x4xf32>
    %14 = vector.multi_reduction <add>, %13, %cst_8 [2] : vector<1x4x256xf32> to vector<1x4xf32>
    %15 = arith.mulf %10, %10 : vector<1x4x256xf32>
    %cst_9 = arith.constant dense<0.000000e+00> : vector<1x4xf32>
    %16 = vector.multi_reduction <add>, %15, %cst_9 [2] : vector<1x4x256xf32> to vector<1x4xf32>
    %c0_10 = arith.constant 0 : index
    %c0_11 = arith.constant 0 : index
    %c0_12 = arith.constant 0 : index
    %c0_13 = arith.constant 0 : index
    %17 = vector.load %arg4[%c0_10, %c0_11, %c0_12, %c0_13] : memref<1x1x3x4xf32, #tpu.memory_space<vmem>>, vector<1x1x1x4xf32>
    %18 = vector.shape_cast %17 : vector<1x1x1x4xf32> to vector<1x4xf32>
    %19 = vector.shape_cast %12 : vector<1x4xf32> to vector<1x1x1x4xf32>
    tpu.vector_store %arg4[%c0_10, %c0_11, %c0_12, %c0_13], %19 {strides = array<i32>} : memref<1x1x3x4xf32, #tpu.memory_space<vmem>>, vector<1x1x1x4xf32>,
    %c0_14 = arith.constant 0 : index
    %c0_15 = arith.constant 0 : index
    %c1 = arith.constant 1 : index
    %c0_16 = arith.constant 0 : index
    %20 = vector.load %arg4[%c0_14, %c0_15, %c1, %c0_16] : memref<1x1x3x4xf32, #tpu.memory_space<vmem>>, vector<1x1x1x4xf32>
    %21 = vector.shape_cast %20 : vector<1x1x1x4xf32> to vector<1x4xf32>
    %22 = vector.shape_cast %14 : vector<1x4xf32> to vector<1x1x1x4xf32>
    tpu.vector_store %arg4[%c0_14, %c0_15, %c1, %c0_16], %22 {strides = array<i32>} : memref<1x1x3x4xf32, #tpu.memory_space<vmem>>, vector<1x1x1x4xf32>,
    %c0_17 = arith.constant 0 : index
    %c0_18 = arith.constant 0 : index
    %c2 = arith.constant 2 : index
    %c0_19 = arith.constant 0 : index
    %23 = vector.load %arg4[%c0_17, %c0_18, %c2, %c0_19] : memref<1x1x3x4xf32, #tpu.memory_space<vmem>>, vector<1x1x1x4xf32>
    %24 = vector.shape_cast %23 : vector<1x1x1x4xf32> to vector<1x4xf32>
    %25 = vector.shape_cast %16 : vector<1x4xf32> to vector<1x1x1x4xf32>
    tpu.vector_store %arg4[%c0_17, %c0_18, %c2, %c0_19], %25 {strides = array<i32>} : memref<1x1x3x4xf32, #tpu.memory_space<vmem>>, vector<1x1x1x4xf32>,
    return
  }
  func.func @transform_0(%arg0: i32, %arg1: i32) -> (i32, i32, i32) {
    %c0_i32 = arith.constant 0 : i32
    %c0_i32_0 = arith.constant 0 : i32
    return %arg0, %c0_i32, %arg1 : i32, i32, i32
  }
  func.func @transform_1(%arg0: i32, %arg1: i32) -> (i32, i32, i32) {
    %c0_i32 = arith.constant 0 : i32
    %c0_i32_0 = arith.constant 0 : i32
    return %arg0, %c0_i32, %arg1 : i32, i32, i32
  }
  func.func @transform_2(%arg0: i32, %arg1: i32) -> (i32, i32, i32, i32) {
    %c0_i32 = arith.constant 0 : i32
    %c0_i32_0 = arith.constant 0 : i32
    %c0_i32_1 = arith.constant 0 : i32
    return %arg0, %arg1, %c0_i32, %c0_i32_0 : i32, i32, i32, i32
  }
}

</mosaic_0001>

<bundles_post_ra>
// kernel: tpu_custom_call.1
= control target key start
LH: loop header
LB: loop body
LE: loop exit
PB: predicated region body
PF: predicated region fallthrough
CT: control target
= control target key end

     0   :  { %7 = vsyncpa [#allocation3], 0  ;;  %s796_s0 = inlined_call_operand.hbm [shape: f32[2,4,256], index: 0, kind: input, shape index: {}]   ;;  %s797_s1 = inlined_call_operand.hbm [shape: f32[2,4,256], index: 1, kind: input, shape index: {}]   ;;  %s798_s2 = inlined_call_operand.vmem [shape: f32[2,1,3,4], index: 2, kind: output, shape index: {}]  }
   0x1   :  { %9 = vsyncpa [#allocation3 + $0x1], 0 }
   0x2   :  { %10 = vsyncpa [#allocation5], 0 }
   0x3   :  { %12 = vsyncpa [#allocation5 + $0x1], 0  ;;  %s618_s9 = smov 0   ;;  %s620_s10 = smov 0  }
   0x4   :  { %s622_s11 = smov 0   ;;  %s624_s12 = smov 0  }
   0x5   :  { %s626_s13 = smov 0   ;;  %s628_s14 = smov 0  }
   0x6 LB: > { %s402_s15 = sadd.s32 4294967295, %s599_s14   ;;  %s30_s16 = sadd.s32 1, %s595_s13  ;;  %s599_s14 = sphi %s628_s14, %s18_s14   ;;  %s595_s13 = sphi %s626_s13, %s812_s13   ;;  %s591_s12 = sphi %s624_s12, %s811_s12   ;;  %s587_s11 = sphi %s622_s11, %s810_s11   ;;  %s583_s10 = sphi %s620_s10, %s809_s10   ;;  %s579_s9 = sphi %s618_s9, %s808_s9  }
   0x7   : > { %p32_p0 = scmp.ge.s32.totalorder %s30_s16, 2  ;;  %s39_s17 = sadd.s32 1, %s587_s11 }
   0x8   : > { %p46_p1 = scmp.ne.s32.totalorder %s587_s11, %s583_s10  ;;  %p47_p2 = scmp.eq.s32.totalorder %s599_s14, 0 }
   0x9   : > { %s814_s16 = smov (%p32_p0, %s30_s16), 0  ;;  %p52_p4 = scmp.ne.s32.totalorder %s583_s10, %s579_s9 }
   0xa   : > { %p654_p3 = por %p47_p2, %p46_p1  ;;  %s34_s19 = ssub.s32 %s595_s13, %s814_s16 }
   0xb   : > { %p53_p5 = scmp.eq.s32.totalorder %s402_s15, 0  ;;  %p37_p6 = scmp.eq.s32.totalorder %s34_s19, 0 }
   0xc   : > { %p432_p8 = scmp.lt.s32.totalorder %s599_s14, 2  ;;  %s670_s22 = sand.u32 1, %s587_s11  }
   0xd   : > { %p661_p7 = por %p53_p5, %p52_p4  ;;  %s419_s23 = sshll.u32 %s595_s13, 7 }
   0xe   : > { %s667_s21 = scalar_select %p37_p6, %s587_s11, %s39_s17  }
   0xf   : > { %s801_s20 = scalar_select %p661_p7, 1, 0 }
  0x10   : > { %s406_s24 = sshll.u32 %s670_s22, 3  ;;  %s679_s27 = scalar_lea.hbm %s796_s0, %s419_s23 }
  0x11   : > { %s136_s28 = scalar_lea.vmem [#allocation2], %s406_s24  ;;  %p685_p9 = pnand %p432_p8, %p654_p3 }
  0x12   : > { %s146_s29 = sshll.u32 %s136_s28, 4  ;;  %s133_s3 = scalar_lea.sflag [#allocation3], %s670_s22  ;;  %s689_s29 = int_to_ptr.vmem [resolvable:$true] %s146_s29 }
  0x13   : > { %s485_s4 = scalar_lea.hbm %s679_s27, 128  ;;  %p487_p13 = pneg %p685_p9 }
  0x14   : > { %p486_p12 = scmp.ne.s32.totalorder %s679_s27, %s485_s4  ;;  %s490_s7 = scalar_lea.hbm %s796_s0, 256 }
  0x15   : > { %p491_p2 = scmp.lt.u32.totalorder %s679_s27, %s796_s0  ;;  %p492_p3 = scmp.lt.u32.totalorder %s490_s7, %s485_s4 }
  0x16   : > { %p488_p0 = pnand %p487_p13, %p486_p12  ;;  %p494_p5 = scmp.lt.u32.totalorder %s485_s4, %s679_s27 }
  0x17   : > { %p493_p4 = por %p492_p3, %p491_p2 }
  0x18   : > { %p489_p1 = pneg %p488_p0 }
  0x19   : > { %p495_p6 = por %p494_p5, %p493_p4 }
  0x1b   : > { %p496_p8 = pnand %p495_p6, %p489_p1 }
  0x1d   : > { %499 = shalt.err (!%p496_p8)
}
  0x1e   : > { %s500_s15 = scalar_lea.vmem %s689_s29, 128  ;;  %s601_s17 = smov [#allocation2]  }
  0x1f   : > { %p501_p12 = scmp.ne.s32.totalorder %s689_s29, %s500_s15  ;;  %s505_s18 = sshll.u32 %s601_s17, 4  ;;  %s506_s18 = int_to_ptr.vmem [resolvable:$false] %s505_s18 }
  0x20   : > { %s507_s19 = scalar_lea.vmem %s506_s18, 256  ;;  %p508_p11 = scmp.lt.s32.totalorder %s689_s29, %s506_s18 }
  0x21   : > { %p503_p0 = pnand %p501_p12, %p487_p13  ;;  %p509_p2 = scmp.lt.s32.totalorder %s507_s19, %s500_s15 }
  0x23   : > { %p504_p10 = pneg %p503_p0  ;;  %p510_p3 = por %p509_p2, %p508_p11 }
  0x25   : > { %p511_p4 = pnand %p510_p3, %p504_p10 }
  0x27   : > { %514 = shalt.err (!%p511_p4)
}
  0x28   : > { %428 = dma.hbm_to_vmem [thread:$0]  (!%p685_p9), %s679_s27, 128, %s689_s29, %s133_s3  }
  0x29   : > { %p803_p1 = scmp.lt.s32.totalorder %s599_s14, 3  ;;  %p804_p5 = scmp.ge.s32.totalorder %s599_s14, 1 }
  0x2a   : > { %s732_s4 = scalar_lea.hbm %s797_s1, %s419_s23  ;;  %s157_s5 = scalar_lea.vmem [#allocation4], %s406_s24 }
  0x2b   : > { %p723_p6 = pnand %p804_p5, %p803_p1  ;;  %s167_s6 = sshll.u32 %s157_s5, 4  ;;  %s168_s6 = int_to_ptr.vmem [resolvable:$true] %s167_s6 }
  0x2c   : > { %s154_s27 = scalar_lea.sflag [#allocation5], %s670_s22  ;;  %s515_s29 = scalar_lea.hbm %s732_s4, 128 }
  0x2d   : > { %s805_s25 = scalar_select %p723_p6, 1, 0 }
  0x2e   : > { %p516_p10 = scmp.ne.s32.totalorder %s732_s4, %s515_s29  ;;  %s520_s23 = scalar_lea.hbm %s797_s1, 256 }
  0x2f   : > { %p521_p12 = scmp.lt.u32.totalorder %s732_s4, %s797_s1  ;;  %p522_p0 = scmp.lt.u32.totalorder %s520_s23, %s515_s29 }
  0x30   : > { %p518_p11 = pnand %p516_p10, %p487_p13  ;;  %p524_p3 = scmp.lt.u32.totalorder %s515_s29, %s732_s4 }
  0x31   : > { %p523_p2 = por %p522_p0, %p521_p12 }
  0x32   : > { %p519_p8 = pneg %p518_p11 }
  0x33   : > { %p525_p4 = por %p524_p3, %p523_p2 }
  0x35   : > { %p526_p1 = pnand %p525_p4, %p519_p8 }
  0x37   : > { %529 = shalt.err (!%p526_p1)
}
  0x38   : > { %s530_s22 = scalar_lea.vmem %s168_s6, 128  ;;  %s602_s24 = smov [#allocation4]  }
  0x39   : > { %p531_p5 = scmp.ne.s32.totalorder %s168_s6, %s530_s22  ;;  %s535_s15 = sshll.u32 %s602_s24, 4  ;;  %s536_s15 = int_to_ptr.vmem [resolvable:$false] %s535_s15 }
  0x3a   : > { %s537_s17 = scalar_lea.vmem %s536_s15, 256  ;;  %p538_p7 = scmp.lt.s32.totalorder %s168_s6, %s536_s15 }
  0x3b   : > { %p533_p10 = pnand %p531_p5, %p487_p13  ;;  %p539_p6 = scmp.lt.s32.totalorder %s537_s17, %s530_s22 }
  0x3d   : > { %p534_p11 = pneg %p533_p10  ;;  %p540_p0 = por %p539_p6, %p538_p7 }
  0x3f   : > { %p541_p12 = pnand %p540_p0, %p534_p11 }
  0x41   : > { %544 = shalt.err (!%p541_p12)
}
  0x42   : > { %431 = dma.hbm_to_vmem [thread:$0]  (!%p685_p9), %s732_s4, 128, %s168_s6, %s154_s27  }
  0x43   : > { %p806_p8 = scmp.ne.s32.totalorder %s805_s25, 0 }
  0x44   : > { %s178_s18 = sand.u32 (!%p806_p8), 1, %s583_s10   ;;  %p807_p13 = scmp.ne.s32.totalorder (!%p806_p8), %s801_s20, 0 }
  0x45   : > { %176 = sbr.rel (%p806_p8) target bundleno = 262 (0x106), region = 28  ;;  %s413_s19 = sshll.u32 (!%p806_p8), %s178_s18, 3 }
  0x46   : > { %s179_s26 = scalar_lea.sflag (!%p806_p8), [#allocation3], %s178_s18  ;;  %s182_s28 = scalar_lea.vmem (!%p806_p8), [#allocation2], %s413_s19 }
  0x4c   : > { %570 = dma.done.wait (%p807_p13), %s179_s26, 128  }
  0x4d   : > { %572 = vsyncadd (%p807_p13), %s179_s26, 4294967168  ;;  %s188_s5 = scalar_lea.sflag [#allocation5], %s178_s18  ;;  %s191_s29 = scalar_lea.vmem [#allocation4], %s413_s19 }
  0x4e   : > { %574 = dma.done.wait (%p807_p13), %s188_s5, 128  }
  0x4f   : > { %576 = vsyncadd (%p807_p13), %s188_s5, 4294967168  ;;  %v228_v0 = vld [vmem:[%s182_s28] sm:$0xff]  ;;  %v235_v1 = vld [vmem:[%s191_s29] sm:$0xff]  ;;  %vm242_vm0 = vcmask 1043456   ;;  %p221_p7 = scmp.lt.s32.totalorder %s591_s12, 1  ;;  %v267_v23 = vlaneseq  ;;  %vm274_vm1 = vcmask 24576  }
  0x50   : > { %v416_v2 = vmul.f32 -1.442695, %v228_v0  ;;  %v236_v3 = vmul.f32 0.9, %v235_v1 }
  0x51   : > { %s816_s12 = smov (!%p221_p7, %s591_s12), 1  ;;  %v268_v24 = vand.u32 127, %v267_v23  ;;  %v270_v25 = vshrl.u32 %v267_v23, 7 }
  0x52   : > { %481 = vpow2.f32 %v416_v2  ;;  %v237_v4 = vadd.f32 0.025, %v236_v3  ;;  %s415_s20 = sshll.u32 %s816_s12, 2 }
  0x53   : > { %v271_v26 = vsub.s32 %v268_v24, %v270_v25  ;;  %s227_s4 = scalar_lea.vmem %s798_s2, %s415_s20 }
  0x54   : > { %v257_v5 = vmul.f32 %v237_v4, %v237_v4 }
  0x56   : > { %v259_v6 = vcombine.high %v257_v5, %v257_v5  ;;  %v261_v7 = vsel %vm242_vm0, %v257_v5, 0.0 }
  0x58   : > { %v262_v8 = vsel %vm242_vm0, %v259_v6, 0.0 }
  0x59   : > { %v263_v9 = vadd.f32 %v262_v8, %v261_v7 }
  0x5b   : > { %264 = vadd.xlane.f32.xlu1 %v263_v9 }
  0x5c   : > { %v482_v10 = vpop.eup %481 }
  0x5d   : > { %v232_v11 = vadd.f32 1.0, %v482_v10 }
  0x5f   : > { %483 = vrcp.f32 %v232_v11 }
  0x69   : > { %v484_v12 = vpop.eup %483 }
  0x6a   : > { %v238_v13 = vmul.f32 %v484_v12, %v237_v4  ;;  %v248_v14 = vmul.f32 %v484_v12, %v484_v12 }
  0x6c   : > { %v240_v15 = vcombine.high %v238_v13, %v238_v13  ;;  %v243_v16 = vsel %vm242_vm0, %v238_v13, 0.0  ;;  %v250_v17 = vcombine.high %v248_v14, %v248_v14  ;;  %v252_v19 = vsel %vm242_vm0, %v248_v14, 0.0 }
  0x6e   : > { %v244_v18 = vsel %vm242_vm0, %v240_v15, 0.0  ;;  %v253_v20 = vsel %vm242_vm0, %v250_v17, 0.0 }
  0x6f   : > { %v245_v21 = vadd.f32 %v244_v18, %v243_v16  ;;  %v254_v22 = vadd.f32 %v253_v20, %v252_v19 }
  0x71   : > { %246 = vadd.xlane.f32.xlu0 %v245_v21 }
  0x75   : > { %255 = vadd.xlane.f32.xlu0 %v254_v22 }
  0xe8   : > { %v265_v27 = vpop.xlane.xlu1 %264 }
  0xe9   : > { %v287_v28 = vrot.slane %v265_v27, %v271_v26 }
  0xeb   : > { %289 = vst.msk [vmem:[%s227_s4 + $0x2] sm:$0x1] %vm274_vm1, %v287_v28 }
  0xfe   : > { %v247_v29 = vpop.xlane.xlu0 %246 }
  0xff   : > { %v272_v30 = vrot.slane %v247_v29, %v271_v26 }
 0x101   : > { %275 = vst.msk [vmem:[%s227_s4] sm:$0x1] %vm274_vm1, %v272_v30 }
 0x102   : > { %v256_v31 = vpop.xlane.xlu0 %255 }
 0x103   : > { %v280_v32 = vrot.slane %v256_v31, %v271_v26 }
 0x105   : > { %282 = vst.msk [vmem:[%s227_s4 + $0x1] sm:$0x1] %vm274_vm1, %v280_v32 }
 0x106 PF: > { %s18_s14 = sadd.s32 1, %s599_s14   ;;  %s808_s9 = smov %s583_s10 }
 0x107   : > { %p15_p9 = scmp.ge.s32.totalorder %s18_s14, 4   ;;  %s809_s10 = smov %s587_s11 }
 0x108   : > { %s810_s11 = smov %s667_s21  ;;  %s811_s12 = smov %s595_s13 }
 0x109   : > { %s812_s13 = smov %s814_s16  ;;  %17 = sbr.rel (!%p15_p9) target bundleno = 6 (0x6), region = 81 }
 0x110   :  { %315 = vsyncpa [#allocation3], 1 }
 0x111   :  { %317 = vsyncpa [#allocation3 + $0x1], 1 }
 0x112   :  { %318 = vsyncpa [#allocation5], 1 }
 0x113   :  { %320 = vsyncpa [#allocation5 + $0x1], 1 }

</bundles_post_ra>
